<compile_context>
chip_gen: v7x
topology: tpu7x:2x2x1
jax: 0.10.0
libtpu: 0.0.40
codegen_flags: <defaults>
</compile_context>

<pallas_src>
import functools

import jax
import jax.numpy as jnp
from jax.experimental import pallas as pl
from jax.experimental.pallas import tpu as pltpu


# ---------------------------------------------------------------------------
# Helpers
# ---------------------------------------------------------------------------
_VMEM_LIMIT = 32 * 1024 * 1024        # explicit; safe on v5e/v6e/v7x
_RESIDENT_BUDGET = 20 * 1024 * 1024   # conservative on-chip budget for resident paths
_TM_CAP, _TK_CAP, _TN_CAP = 256, 2048, 512


def _round_up(x, m):
    return ((x + m - 1) // m) * m


def _cdiv(a, b):
    return -(-a // b)


def _pad_to(a, axis, target):
    cur = a.shape[axis]
    if cur == target:
        return a
    pads = [(0, 0)] * a.ndim
    pads[axis] = (0, target - cur)
    return jnp.pad(a, pads)


def _sublane(dtype):
    # f32 -> 8, bf16 -> 16, int8/fp8 -> 32 (avoid half-packed vregs).
    return max(8, 32 // jnp.dtype(dtype).itemsize)


def _padded_dim(d):
    # Lane-dense padding target (multiple of 128); == d when already aligned.
    return d if d % 128 == 0 else _round_up(d, 128)


def _lane_tile(dp, cap):
    # Largest multiple-of-128 divisor of dp that is <= cap (dp % 128 == 0).
    best = 128
    for t in range(128, min(dp, cap) + 1, 128):
        if dp % t == 0:
            best = t
    return best


def _choose_m(M, sub, cap=_TM_CAP):
    # Balanced M tiling: Mp - M stays small, and >= 2 parallel M tiles are
    # created when possible so both v7x TensorCores have work.
    if M <= sub:
        tm = sub
    else:
        n_tiles = _cdiv(M, cap)
        if n_tiles == 1 and M >= 2 * sub:
            n_tiles = 2
        tm = _round_up(_cdiv(M, n_tiles), sub)
    Mp = _round_up(M, tm)
    return tm, Mp


# ---------------------------------------------------------------------------
# Kernels
# ---------------------------------------------------------------------------
def _shared_resident_kernel(x_ref, w_ref, b_ref, o_ref):
    # Whole (Kp, Np) weight resident in VMEM; grid only over M tiles.
    o_ref[...] = (jnp.dot(x_ref[...].astype(w_ref.dtype), w_ref[...],
                          preferred_element_type=jnp.float32)
                  + b_ref[...]).astype(o_ref.dtype)


def _shared_tiled_kernel(x_ref, w_ref, b_ref, o_ref, acc_ref):
    # grid = (M_tiles, N_tiles, K_tiles); K innermost reduction.
    k = pl.program_id(2)

    @pl.when(k == 0)
    def _():
        acc_ref[...] = jnp.zeros_like(acc_ref)

    acc_ref[...] += jnp.dot(x_ref[...].astype(w_ref.dtype), w_ref[...],
                            preferred_element_type=jnp.float32)

    @pl.when(k == pl.num_programs(2) - 1)
    def _():
        o_ref[...] = (acc_ref[...] + b_ref[...]).astype(o_ref.dtype)


def _indiv_resident_kernel(x_ref, w_ref, b_ref, o_ref):
    # Per-variable (Kp, Np) weight slab resident while B tiles stream.
    o_ref[...] = (jnp.dot(x_ref[...].astype(w_ref.dtype), w_ref[0],
                          preferred_element_type=jnp.float32)
                  + b_ref[0]).astype(o_ref.dtype)


def _indiv_tiled_kernel(x_ref, w_ref, b_ref, o_ref, acc_ref):
    # grid = (V, B_tiles, N_tiles, K_tiles); K innermost reduction.
    k = pl.program_id(3)

    @pl.when(k == 0)
    def _():
        acc_ref[...] = jnp.zeros_like(acc_ref)

    acc_ref[...] += jnp.dot(x_ref[...].astype(w_ref.dtype), w_ref[0],
                            preferred_element_type=jnp.float32)

    @pl.when(k == pl.num_programs(3) - 1)
    def _():
        o_ref[...] = (acc_ref[...] + b_ref[0]).astype(o_ref.dtype)


# ---------------------------------------------------------------------------
# One-time parameter preparation (pad + cast OUTSIDE the per-call path)
# ---------------------------------------------------------------------------
def prepare_params(w, b, *, individual, compute_dtype=jnp.bfloat16):
    """Pad weights to lane-dense (Kp, Np) and cast to compute_dtype once.

    individual=False: w (nf, TW), b (TW,)     -> wp (Kp, Np),     bp (1, Np) f32
    individual=True : w (V, nf, TW), b (V, TW)-> wp (V, Kp, Np),  bp (V, 1, Np) f32
    Zero K/N padding keeps the matmul + bias exact for the real region.
    """
    cdt = jnp.dtype(compute_dtype)
    if individual:
        V, nf, TW = w.shape
        Kp, Np = _padded_dim(nf), _padded_dim(TW)
        wp = _pad_to(_pad_to(w.astype(cdt), 1, Kp), 2, Np)
        bp = _pad_to(b.astype(jnp.float32), 1, Np).reshape(V, 1, Np)
    else:
        nf, TW = w.shape
        Kp, Np = _padded_dim(nf), _padded_dim(TW)
        wp = _pad_to(_pad_to(w.astype(cdt), 0, Kp), 1, Np)
        bp = _pad_to(b.astype(jnp.float32).reshape(1, TW), 1, Np)
    return wp, bp


# ---------------------------------------------------------------------------
# Forward
# ---------------------------------------------------------------------------
@functools.partial(jax.jit, static_argnames=("individual", "target_window"))
def flatten_head_forward(x, wp, bp, *, individual, target_window):
    """Flatten_Head forward.

    x : (B, n_vars, d_model, patch_num), wp/bp from prepare_params().
    Returns (B, n_vars, target_window) in x.dtype. head_dropout=0 -> identity.
    """
    B, V, D, P = x.shape
    nf = D * P
    TW = target_window
    out_dtype = x.dtype
    out_item = jnp.dtype(out_dtype).itemsize
    cdt_item = jnp.dtype(wp.dtype).itemsize
    sub = _sublane(out_dtype)
    x_flat = x.reshape(B, V, nf)  # nn.Flatten(start_dim=-2): contiguous, free

    if not individual:
        Kp, Np = wp.shape
        M = B * V
        tm, Mp = _choose_m(M, sub)

        x2 = x_flat.reshape(M, nf)                 # free
        if Kp != nf:
            x2 = _pad_to(x2, 1, Kp)                # only when nf % 128 != 0
        if Mp != M:
            x2 = _pad_to(x2, 0, Mp)

        resident = (2 * Kp * Np * cdt_item + 2 * tm * Kp * out_item
                    + 2 * tm * Np * out_item + 2 * Np * 4) <= _RESIDENT_BUDGET

        cost = pl.CostEstimate(
            flops=2 * Mp * Kp * Np, transcendentals=0,
            bytes_accessed=(Mp * Kp * out_item + Kp * Np * cdt_item
                            + Np * 4 + Mp * Np * out_item))

        if resident:
            out = pl.pallas_call(
                _shared_resident_kernel,
                out_shape=jax.ShapeDtypeStruct((Mp, Np), out_dtype),
                grid=(Mp // tm,),
                in_specs=[
                    pl.BlockSpec((tm, Kp), lambda i: (i, 0)),
                    pl.BlockSpec((Kp, Np), lambda i: (0, 0)),   # weight DMA'd once
                    pl.BlockSpec((1, Np), lambda i: (0, 0)),
                ],
                out_specs=pl.BlockSpec((tm, Np), lambda i: (i, 0)),
                compiler_params=pltpu.CompilerParams(
                    dimension_semantics=("parallel",),
                    vmem_limit_bytes=_VMEM_LIMIT),
                cost_estimate=cost,
            )(x2, wp, bp)
        else:
            tk = _lane_tile(Kp, _TK_CAP)
            tn = _lane_tile(Np, _TN_CAP)
            out = pl.pallas_call(
                _shared_tiled_kernel,
                out_shape=jax.ShapeDtypeStruct((Mp, Np), out_dtype),
                grid=(Mp // tm, Np // tn, Kp // tk),
                in_specs=[
                    pl.BlockSpec((tm, tk), lambda i, j, k: (i, k)),
                    pl.BlockSpec((tk, tn), lambda i, j, k: (k, j)),
                    pl.BlockSpec((1, tn), lambda i, j, k: (0, j)),
                ],
                out_specs=pl.BlockSpec((tm, tn), lambda i, j, k: (i, j)),
                scratch_shapes=[pltpu.VMEM((tm, tn), jnp.float32)],
                compiler_params=pltpu.CompilerParams(
                    dimension_semantics=("parallel", "parallel", "arbitrary"),
                    vmem_limit_bytes=_VMEM_LIMIT),
                cost_estimate=cost,
            )(x2, wp, bp)
        return out[:M, :TW].reshape(B, V, TW)

    else:
        _, Kp, Np = wp.shape
        tm, Bp = _choose_m(B, sub)

        if Kp == nf:
            xp = x_flat.reshape(B, V * nf)         # contiguous -> free
        else:
            # TODO(synk): nf % 128 != 0 forces one interleaved activation pad;
            # choose d_model*patch_num as a multiple of 128 to avoid it.
            xp = _pad_to(x_flat, 2, Kp).reshape(B, V * Kp)
        if Bp != B:
            xp = _pad_to(xp, 0, Bp)

        resident = (2 * Kp * Np * cdt_item + 2 * tm * Kp * out_item
                    + 2 * tm * Np * out_item + 2 * Np * 4) <= _RESIDENT_BUDGET

        cost = pl.CostEstimate(
            flops=2 * V * Bp * Kp * Np, transcendentals=0,
            bytes_accessed=(Bp * V * Kp * out_item + V * Kp * Np * cdt_item
                            + V * Np * 4 + Bp * V * Np * out_item))

        if resident:
            out = pl.pallas_call(
                _indiv_resident_kernel,
                out_shape=jax.ShapeDtypeStruct((Bp, V * Np), out_dtype),
                grid=(V, Bp // tm),
                in_specs=[
                    pl.BlockSpec((tm, Kp), lambda v, i: (i, v)),
                    pl.BlockSpec((1, Kp, Np), lambda v, i: (v, 0, 0)),
                    pl.BlockSpec((1, 1, Np), lambda v, i: (v, 0, 0)),
                ],
                out_specs=pl.BlockSpec((tm, Np), lambda v, i: (i, v)),
                compiler_params=pltpu.CompilerParams(
                    dimension_semantics=("parallel", "parallel"),
                    vmem_limit_bytes=_VMEM_LIMIT),
                cost_estimate=cost,
            )(xp, wp, bp)
        else:
            tk = _lane_tile(Kp, _TK_CAP)
            tn = _lane_tile(Np, _TN_CAP)
            kt, nt = Kp // tk, Np // tn
            out = pl.pallas_call(
                _indiv_tiled_kernel,
                out_shape=jax.ShapeDtypeStruct((Bp, V * Np), out_dtype),
                grid=(V, Bp // tm, nt, kt),
                in_specs=[
                    pl.BlockSpec((tm, tk),
                                 lambda v, i, j, k, kt=kt: (i, v * kt + k)),
                    pl.BlockSpec((1, tk, tn), lambda v, i, j, k: (v, k, j)),
                    pl.BlockSpec((1, 1, tn), lambda v, i, j, k: (v, 0, j)),
                ],
                out_specs=pl.BlockSpec((tm, tn),
                                       lambda v, i, j, k, nt=nt: (i, v * nt + j)),
                scratch_shapes=[pltpu.VMEM((tm, tn), jnp.float32)],
                compiler_params=pltpu.CompilerParams(
                    dimension_semantics=("parallel", "parallel", "parallel",
                                         "arbitrary"),
                    vmem_limit_bytes=_VMEM_LIMIT),
                cost_estimate=cost,
            )(xp, wp, bp)
        return out.reshape(Bp, V, Np)[:B, :, :TW]


# ---------------------------------------------------------------------------
# Deterministic parameter init (torch nn.Linear shapes, stored transposed)
# ---------------------------------------------------------------------------
def init_params(key, n_vars, nf, target_window, individual):
    bound = 1.0 / jnp.sqrt(jnp.float32(nf))
    kw, kb = jax.random.split(key)
    if individual:
        w = jax.random.uniform(kw, (n_vars, nf, target_window), jnp.float32, -bound, bound)
        b = jax.random.uniform(kb, (n_vars, target_window), jnp.float32, -bound, bound)
    else:
        w = jax.random.uniform(kw, (nf, target_window), jnp.float32, -bound, bound)
        b = jax.random.uniform(kb, (target_window,), jnp.float32, -bound, bound)
    return w, b


def _reference(x, w, b, individual):
    B, V, D, P = x.shape
    z = x.reshape(B, V, D * P)
    if individual:
        return jnp.einsum("bvf,vft->bvt", z, w) + b[None, :, :]
    return jnp.einsum("bvf,ft->bvt", z, w) + b[None, None, :]


if __name__ == "__main__":
    # Small shapes consistent with the module: x = (bs, n_vars, d_model, patch_num)
    B, V, D, P = 2, 4, 16, 16
    nf = D * P            # 256 (multiple of 128 -> no activation padding)
    target_window = 32

    key = jax.random.PRNGKey(0)
    kx, kp1, kp2 = jax.random.split(key, 3)
    x = jax.random.normal(kx, (B, V, D, P), jnp.float32)

    # --- shared (individual=False), f32 compute for strict comparison ---
    w_s, b_s = init_params(kp1, V, nf, target_window, individual=False)
    wp_s, bp_s = prepare_params(w_s, b_s, individual=False, compute_dtype=jnp.float32)
    y_shared = flatten_head_forward(x, wp_s, bp_s, individual=False,
                                    target_window=target_window)
    jax.block_until_ready(y_shared)
    ref_shared = _reference(x, w_s, b_s, individual=False)
    assert y_shared.shape == (B, V, target_window)
    assert jnp.allclose(y_shared, ref_shared, atol=5e-4, rtol=5e-4)

    # --- individual (individual=True), f32 compute ---
    w_i, b_i = init_params(kp2, V, nf, target_window, individual=True)
    wp_i, bp_i = prepare_params(w_i, b_i, individual=True, compute_dtype=jnp.float32)
    y_indiv = flatten_head_forward(x, wp_i, bp_i, individual=True,
                                   target_window=target_window)
    jax.block_until_ready(y_indiv)
    ref_indiv = _reference(x, w_i, b_i, individual=True)
    assert y_indiv.shape == (B, V, target_window)
    assert jnp.allclose(y_indiv, ref_indiv, atol=5e-4, rtol=5e-4)

    # --- default bf16-compute path (weight stream halved; f32 accumulation) ---
    wp_bf, bp_bf = prepare_params(w_s, b_s, individual=False)  # bf16 default
    y_bf16 = flatten_head_forward(x, wp_bf, bp_bf, individual=False,
                                  target_window=target_window)
    jax.block_until_ready(y_bf16)
    assert y_bf16.shape == (B, V, target_window)
    assert jnp.allclose(y_bf16.astype(jnp.float32), ref_shared, atol=5e-2, rtol=5e-2)

    # TODO(synk): training-mode dropout (head_dropout > 0) not implemented; it is
    # identity at inference and with the default head_dropout=0.
    print("KERNEL_OK")
</pallas_src>

<mosaic_0001>
module attributes {stable_mosaic.version = 11 : i64} {
  func.func @_shared_resident_kernel(%arg0: i32, %arg1: memref<8x256xf32, #tpu.memory_space<vmem>>, %arg2: memref<256x128xf32, #tpu.memory_space<vmem>>, %arg3: memref<1x128xf32, #tpu.memory_space<vmem>>, %arg4: memref<8x128xf32, #tpu.memory_space<vmem>>) attributes {dimension_semantics = [#tpu.dimension_semantics<parallel>], iteration_bounds = array<i64: 1>, scalar_prefetch = 0 : i64, scratch_operands = 0 : i64, tpu.core_type = #tpu.core_type<tc>, window_params = [{transform_indices = @transform_0, window_bounds = array<i64: 8, 256>}, {pipeline_mode = #tpu.pipeline_mode<synchronous>, transform_indices = @transform_1, window_bounds = array<i64: 256, 128>}, {pipeline_mode = #tpu.pipeline_mode<synchronous>, transform_indices = @transform_2, window_bounds = array<i64: 1, 128>}, {transform_indices = @transform_3, window_bounds = array<i64: 8, 128>}]} {
    %c0 = arith.constant 0 : index
    %c0_0 = arith.constant 0 : index
    %0 = vector.load %arg1[%c0, %c0_0] : memref<8x256xf32, #tpu.memory_space<vmem>>, vector<8x256xf32>
    %c0_1 = arith.constant 0 : index
    %c0_2 = arith.constant 0 : index
    %1 = vector.load %arg2[%c0_1, %c0_2] : memref<256x128xf32, #tpu.memory_space<vmem>>, vector<256x128xf32>
    %cst = arith.constant dense<0.000000e+00> : vector<8x128xf32>
    %2 = tpu.matmul %0, %1, %cst {dimension_numbers = #tpu.dot_dimension_numbers<[1], [0], [0], [1], [0, 0, 1, 1], [], []>} : vector<8x256xf32>, vector<256x128xf32>, vector<8x128xf32> -> vector<8x128xf32>
    %c0_3 = arith.constant 0 : index
    %c0_4 = arith.constant 0 : index
    %3 = vector.load %arg3[%c0_3, %c0_4] : memref<1x128xf32, #tpu.memory_space<vmem>>, vector<1x128xf32>
    %4 = vector.broadcast %3 : vector<1x128xf32> to vector<8x128xf32>
    %5 = arith.addf %2, %4 : vector<8x128xf32>
    %c0_5 = arith.constant 0 : index
    %c0_6 = arith.constant 0 : index
    %6 = vector.load %arg4[%c0_5, %c0_6] : memref<8x128xf32, #tpu.memory_space<vmem>>, vector<8x128xf32>
    tpu.vector_store %arg4[%c0_5, %c0_6], %5 {strides = array<i32>} : memref<8x128xf32, #tpu.memory_space<vmem>>, vector<8x128xf32>,
    return
  }
  func.func @transform_0(%arg0: i32) -> (i32, i32) {
    %c0_i32 = arith.constant 0 : i32
    %c0_i32_0 = arith.constant 0 : i32
    return %arg0, %c0_i32 : i32, i32
  }
  func.func @transform_1(%arg0: i32) -> (i32, i32) {
    %c0_i32 = arith.constant 0 : i32
    %c0_i32_0 = arith.constant 0 : i32
    %c0_i32_1 = arith.constant 0 : i32
    return %c0_i32, %c0_i32_0 : i32, i32
  }
  func.func @transform_2(%arg0: i32) -> (i32, i32) {
    %c0_i32 = arith.constant 0 : i32
    %c0_i32_0 = arith.constant 0 : i32
    %c0_i32_1 = arith.constant 0 : i32
    return %c0_i32, %c0_i32_0 : i32, i32
  }
  func.func @transform_3(%arg0: i32) -> (i32, i32) {
    %c0_i32 = arith.constant 0 : i32
    %c0_i32_0 = arith.constant 0 : i32
    return %arg0, %c0_i32 : i32, i32
  }
}

</mosaic_0001>

<bundles_post_ra>
// kernel: flatten_head_forward.1
= control target key start
LH: loop header
LB: loop body
LE: loop exit
PB: predicated region body
PF: predicated region fallthrough
CT: control target
= control target key end

     0   :  { %8 = vsyncpa [#allocation3], 0  ;;  %s333_s0 = inlined_call_operand.vmem [shape: f32[8,256], index: 0, kind: input, shape index: {}]   ;;  %s334_s1 = inlined_call_operand.hbm [shape: f32[256,128], index: 1, kind: input, shape index: {}]   ;;  %s335_s2 = inlined_call_operand.vmem [shape: f32[1,128], index: 2, kind: input, shape index: {}]   ;;  %s336_s3 = inlined_call_operand.hbm [shape: f32[8,128], index: 3, kind: output, shape index: {}]  }
   0x1   :  { %9 = vsyncpa [#allocation4], 0  ;;  %s276_s12 = smov [#allocation2]   ;;  %s228_s16 = scalar_lea.hbm %s334_s1, 4096 }
   0x2   :  { %s17_s13 = sshll.u32 %s276_s12, 4  ;;  %p229_p0 = scmp.ne.s32.totalorder %s334_s1, %s228_s16  ;;  %s18_s13 = int_to_ptr.vmem [resolvable:$true] %s17_s13 }
   0x3   :  { %p232_p1 = scmp.lt.u32.totalorder %s228_s16, %s334_s1 }
   0x5   :  { %p234_p2 = pnand %p232_p1, %p229_p0 }
   0x7   :  { %237 = shalt.err (!%p234_p2)
}
   0x8   :  { %s238_s21 = scalar_lea.vmem %s18_s13, 4096  ;;  %p243_p4 = scmp.lt.s32.totalorder %s18_s13, %s18_s13 }
   0x9   :  { %p239_p3 = scmp.ne.s32.totalorder %s18_s13, %s238_s21  ;;  %p244_p5 = scmp.lt.s32.totalorder %s238_s21, %s238_s21 }
   0xb   :  { %p245_p6 = por %p244_p5, %p243_p4 }
   0xd   :  { %p246_p7 = pnand %p245_p6, %p239_p3 }
   0xf   :  { %249 = shalt.err (!%p246_p7)
}
  0x10   :  { %s277_s22 = smov 128   ;;  %s278_s23 = smov 8  }
  0x11   :  { %23 = dma.hbm_to_vmem [thread:$0]  %s334_s1, 4096, %s18_s13, [#allocation3], %s277_s22, %s277_s22, %s278_s23  }
  0x12   :  { %272 = dma.done.wait [#allocation3], 4096  }
  0x13   :  { %273 = vsyncadd [#allocation3], 4294963200  ;;  %v47_v0 = vld [vmem:[#allocation2 + $0x80] sm:$0xff]  ;;  %v48_v1 = vld [vmem:[#allocation2 + $0x88] sm:$0xff]  ;;  %s279_s4 = smov [#allocation5]  }
  0x14   :  { %v31_v2 = vld [vmem:[#allocation2] sm:$0xff]  ;;  %v192_v3 = vpack.c.bf16 %v48_v1, %v47_v0  ;;  %v32_v4 = vld [vmem:[#allocation2 + $0x8] sm:$0xff]  ;;  %v49_v5 = vld [vmem:[#allocation2 + $0x90] sm:$0xff]  ;;  %s147_s5 = sshll.u32 %s279_s4, 4  ;;  %s148_s5 = int_to_ptr.vmem [resolvable:$true] %s147_s5 }
  0x15   :  { %v50_v6 = vld [vmem:[#allocation2 + $0x98] sm:$0xff]  ;;  %v194_v7 = vpack.c.bf16 %v32_v4, %v31_v2  ;;  %v33_v9 = vld [vmem:[#allocation2 + $0x10] sm:$0xff]  ;;  %v51_v11 = vld [vmem:[#allocation2 + $0xa0] sm:$0xff]  ;;  %s250_s6 = scalar_lea.vmem %s148_s5, 128  ;;  %p255_p9 = scmp.lt.s32.totalorder %s148_s5, %s148_s5 }
  0x16   :  { %v196_v8 = vpack.c.bf16 %v50_v6, %v49_v5  ;;  %v34_v10 = vld [vmem:[#allocation2 + $0x18] sm:$0xff]  ;;  %193 = vmatprep.subr.bf16.mxu0 %v192_v3  ;;  %v52_v12 = vld [vmem:[#allocation2 + $0xa8] sm:$0xff]  ;;  %v35_v15 = vld [vmem:[#allocation2 + $0x20] sm:$0xff]  ;;  %p251_p8 = scmp.ne.s32.totalorder %s148_s5, %s250_s6  ;;  %p256_p10 = scmp.lt.s32.totalorder %s250_s6, %s250_s6 }
  0x17   :  { %195 = vmatpush3.bf16.msra.mxu0 %v194_v7  ;;  %v198_v13 = vpack.c.bf16 %v34_v10, %v33_v9  ;;  %v200_v14 = vpack.c.bf16 %v52_v12, %v51_v11  ;;  %v36_v16 = vld [vmem:[#allocation2 + $0x28] sm:$0xff]  ;;  %v53_v17 = vld [vmem:[#allocation2 + $0xb0] sm:$0xff]  ;;  %v54_v18 = vld [vmem:[#allocation2 + $0xb8] sm:$0xff] }
  0x18   :  { %197 = vmatprep.subr.bf16.mxu0 %v196_v8  ;;  %v202_v19 = vpack.c.bf16 %v36_v16, %v35_v15  ;;  %v204_v20 = vpack.c.bf16 %v54_v18, %v53_v17  ;;  %v37_v21 = vld [vmem:[#allocation2 + $0x30] sm:$0xff]  ;;  %v38_v22 = vld [vmem:[#allocation2 + $0x38] sm:$0xff]  ;;  %v55_v23 = vld [vmem:[#allocation2 + $0xc0] sm:$0xff]  ;;  %p257_p11 = por %p256_p10, %p255_p9 }
  0x19   :  { %v56_v24 = vld [vmem:[#allocation2 + $0xc8] sm:$0xff]  ;;  %v206_v26 = vpack.c.bf16 %v38_v22, %v37_v21  ;;  %v39_v28 = vld [vmem:[#allocation2 + $0x40] sm:$0xff]  ;;  %v57_v30 = vld [vmem:[#allocation2 + $0xd0] sm:$0xff] }
  0x1a   :  { %v30_v25 = vld [vmem:[%s333_s0 + $0x8] sm:$0xff]  ;;  %v208_v27 = vpack.c.bf16 %v56_v24, %v55_v23  ;;  %v58_v31 = vld [vmem:[#allocation2 + $0xd8] sm:$0xff]  ;;  %v41_v34 = vld [vmem:[#allocation2 + $0x50] sm:$0xff]  ;;  %p258_p12 = pnand %p257_p11, %p251_p8 }
  0x1b   :  { %199 = vmatpush3.bf16.msra.mxu0 %v198_v13  ;;  %134 = vmatprep.mubr.f32.mxu0 %v30_v25  ;;  %v40_v29 = vld [vmem:[#allocation2 + $0x48] sm:$0xff]  ;;  %v212_v33 = vpack.c.bf16 %v58_v31, %v57_v30  ;;  %v42_v35 = vld [vmem:[#allocation2 + $0x58] sm:$0xff]  ;;  %v59_v36 = vld [vmem:[#allocation2 + $0xe0] sm:$0xff] }
  0x1c   :  { %201 = vmatprep.subr.bf16.mxu0 %v200_v14  ;;  %v210_v32 = vpack.c.bf16 %v40_v29, %v39_v28  ;;  %v60_v37 = vld [vmem:[#allocation2 + $0xe8] sm:$0xff]  ;;  %v214_v38 = vpack.c.bf16 %v42_v35, %v41_v34  ;;  %v43_v40 = vld [vmem:[#allocation2 + $0x60] sm:$0xff]  ;;  %v61_v42 = vld [vmem:[#allocation2 + $0xf0] sm:$0xff] }
  0x1d   :  { %v216_v39 = vpack.c.bf16 %v60_v37, %v59_v36  ;;  %v44_v41 = vld [vmem:[#allocation2 + $0x68] sm:$0xff]  ;;  %v62_v43 = vld [vmem:[#allocation2 + $0xf8] sm:$0xff]  ;;  %v45_v46 = vld [vmem:[#allocation2 + $0x70] sm:$0xff] }
  0x1e   :  { %v218_v44 = vpack.c.bf16 %v44_v41, %v43_v40  ;;  %v220_v45 = vpack.c.bf16 %v62_v43, %v61_v42  ;;  %v46_v47 = vld [vmem:[#allocation2 + $0x78] sm:$0xff]  ;;  %v29_v49 = vld [vmem:[%s333_s0] sm:$0xff] }
  0x1f   :  { %203 = vmatpush3.bf16.msra.mxu0 %v202_v19  ;;  %v222_v48 = vpack.c.bf16 %v46_v47, %v45_v46  ;;  %v156_v51 = vld [vmem:[%s335_s2] ss:$0 sm:$0xff] }
  0x20   :  { %205 = vmatprep.subr.bf16.mxu0 %v204_v20 }
  0x23   :  { %207 = vmatpush3.bf16.msra.mxu0 %v206_v26 }
  0x24   :  { %209 = vmatprep.subr.bf16.mxu0 %v208_v27 }
  0x27   :  { %211 = vmatpush3.bf16.msra.mxu0 %v210_v32 }
  0x28   :  { %213 = vmatprep.subr.bf16.mxu0 %v212_v33 }
  0x2b   :  { %215 = vmatpush3.bf16.msra.mxu0 %v214_v38 }
  0x2c   :  { %217 = vmatprep.subr.bf16.mxu0 %v216_v39 }
  0x2f   :  { %219 = vmatpush3.bf16.msra.mxu0 %v218_v44 }
  0x30   :  { %221 = vmatprep.subr.bf16.mxu0 %v220_v45 }
  0x33   :  { %223 = vmatpush3.bf16.msra.mxu0 %v222_v48 }
  0x36   :  { %135 = vmatmul.mubr.f32.vlgmr.msra.gmra.mrb[0].mxu0 %v29_v49 }
 0x109   :  { %v189_v50 = vpop.f32.mrb[0].mxu0 }
 0x10a   :  { %v190_v52 = vpop.f32.mrb[1].mxu0 }
 0x10b   :  { %v191_v53 = vadd.f32 %v190_v52, %v189_v50 }
 0x10d   :  { %v137_v54 = vadd.f32 %v191_v53, %v156_v51 }
 0x10f   :  { %140 = vst [vmem:[#allocation5] sm:$0xff] %v137_v54 }
 0x110   :  { %261 = shalt.err (!%p258_p12)
}
 0x111   :  { %s262_s8 = scalar_lea.hbm %s336_s3, 128 }
 0x112   :  { %p263_p13 = scmp.ne.s32.totalorder %s336_s3, %s262_s8  ;;  %p266_p0 = scmp.lt.u32.totalorder %s262_s8, %s336_s3 }
 0x114   :  { %p268_p1 = pnand %p266_p0, %p263_p13 }
 0x116   :  { %271 = shalt.err (!%p268_p1)
}
 0x117   :  { %150 = dma.vmem_to_hbm [thread:$0]  %s148_s5, 128, %s336_s3, [#allocation4]  }
 0x118   :  { %274 = dma.done.wait [#allocation4], 128  }
 0x119   :  { %275 = vsyncadd [#allocation4], 4294967168 }
 0x11a   :  { %154 = vsyncpa [#allocation3], 1 }
 0x11b   :  { %155 = vsyncpa [#allocation4], 1 }

</bundles_post_ra>
